<compile_context>
chip_gen: v5e
topology: v5e:2x2
jax: 0.10.0
libtpu: 0.0.40
codegen_flags: <defaults>
</compile_context>

<pallas_src>
import functools

import jax
import jax.numpy as jnp
from jax.experimental import pallas as pl
from jax.experimental.pallas import tpu as pltpu

VMEM = pltpu.MemorySpace.VMEM

# ------------------------------- configuration ------------------------------ #
B, C, H, W = 2, 4, 16, 16
FEAT_DIM = 32          # args.feat_dim
BASE_N = 16            # args.mlp_out_dim
EMBED_DIM = 64         # head / query / key out_dim
NUM_CLASSES = 16       # cls_head out_dim
HIDDEN_DIM = 64        # MLP hidden width
BOTTLENECK = 128       # cls_head bottleneck_dim (bais-branch output)
BAIS_H1, BAIS_H2 = 256, 512
TEMPERATURE = 0.1
IS_HEAD = True

LANE = 128             # TPU lane width
BLOCK_B = 8            # batch rows per grid step (sublane aligned)
Q_OFF = EMBED_DIM      # query lanes live at [64:128] of the packed head|query slab
CLS_ROW0 = Q_OFF if IS_HEAD else 0   # row offset of cls_head input features in z

# output slab layout (all offsets 128-lane aligned -> unmasked lane-dense stores)
TEMP_OFF, HQ_OFF, COFF_OFF, LOGIT_OFF, BAIS_OFF = 0, 128, 256, 384, 512
OUT_W = 640


# --------------------------------- kernels ---------------------------------- #
def _gelu(x):
    # exact (erf) GELU -- matches torch.nn.GELU() default; math kept in f32
    return 0.5 * x * (1.0 + jax.lax.erf(x * 0.7071067811865475))


def _mm(a, w_ref):
    # bf16 MXU matmul with f32 accumulation
    return jax.lax.dot_general(
        a.astype(jnp.bfloat16), w_ref[...],
        dimension_numbers=(((1,), (0,)), ((), ())),
        preferred_element_type=jnp.float32)


def _key_mlp_kernel(base_ref, w1_ref, b1_ref, w2_ref, b2_ref, w3_ref, b3_ref, o_ref):
    """key_embedding = key.mlp(base): constant branch, run once (hoisted)."""
    h = _gelu(_mm(base_ref[...], w1_ref) + b1_ref[...])
    h = _gelu(_mm(h, w2_ref) + b2_ref[...])
    o_ref[...] = _mm(h, w3_ref) + b3_ref[...]


def _senet_kernel(feats_ref, wb_ref, bb_ref,
                  hqw1_ref, hqb1_ref, hqw2_ref, hqb2_ref, hqw3_ref, hqb3_ref,
                  keyt_ref,
                  cm1_ref, cmb1_ref, cm2_ref, cmb2_ref, cm3_ref, cmb3_ref,
                  cb1_ref, cbb1_ref, cb2_ref, cbb2_ref, cb3_ref, cbb3_ref,
                  out_ref, *, temperature, is_head):
    # ---- backbone linear (stub for the injected external backbone) ----
    x = _mm(feats_ref[...], wb_ref) + bb_ref[...]                 # (BB, 128) f32
    out_ref[:, TEMP_OFF:TEMP_OFF + LANE] = x                      # temp = x (detach in wrapper)

    # ---- head + query MLPs packed: lanes [0:64]=head out, [64:128]=query out ----
    h = _gelu(_mm(x, hqw1_ref) + hqb1_ref[...])                   # (BB, 128)
    h = _gelu(_mm(h, hqw2_ref) + hqb2_ref[...])                   # (BB, 128)
    hq = _mm(h, hqw3_ref) + hqb3_ref[...]                         # (BB, 128): x_proj | q_emb
    out_ref[:, HQ_OFF:HQ_OFF + LANE] = hq

    lane = jax.lax.broadcasted_iota(jnp.int32, hq.shape, 1)

    # ---- Coff = softmax(L2_normalize(q @ key.T, dim=1) / T) ----
    # keyt rows [64:128] hold key_embedding.T, so hq's head lanes contract
    # against zeros; lanes >= BASE_N of c are exactly zero.
    c = _mm(hq, keyt_ref)                                          # (BB, 128)
    inv = jax.lax.rsqrt(jnp.maximum(jnp.sum(c * c, axis=1, keepdims=True), 1e-24))
    c = c * (inv * (1.0 / temperature))
    c = jnp.where(lane < BASE_N, c, -1e30)                         # mask padded lanes
    c = c - jnp.max(c, axis=1, keepdims=True)
    e = jnp.exp(c)
    out_ref[:, COFF_OFF:COFF_OFF + LANE] = e / jnp.sum(e, axis=1, keepdims=True)

    # ---- cls_head input: F.normalize(query_embedding) (or x if not is_head) ----
    if is_head:
        src = jnp.where(lane >= Q_OFF, hq, 0.0)                    # keep only the query lanes
    else:
        src = x
    inv_n = jax.lax.rsqrt(jnp.maximum(jnp.sum(src * src, axis=1, keepdims=True), 1e-24))
    z = src * inv_n                                                # (BB, 128)

    # ---- cls_head.mlp : Linear-GELU-Linear-GELU-Linear ----
    m = _gelu(_mm(z, cm1_ref) + cmb1_ref[...])                     # (BB, 64)
    m = _gelu(_mm(m, cm2_ref) + cmb2_ref[...])                     # (BB, 64)
    out_ref[:, LOGIT_OFF:LOGIT_OFF + LANE] = _mm(m, cm3_ref) + cmb3_ref[...]

    # ---- cls_head.bais : Linear-Sigmoid-Linear-Sigmoid-Linear ----
    g = jax.nn.sigmoid(_mm(z, cb1_ref) + cbb1_ref[...])            # (BB, 256)
    g = jax.nn.sigmoid(_mm(g, cb2_ref) + cbb2_ref[...])            # (BB, 512)
    out_ref[:, BAIS_OFF:BAIS_OFF + LANE] = _mm(g, cb3_ref) + cbb3_ref[...]


# -------------------------- parameter construction -------------------------- #
def trunc_normal(key, shape, std=0.02):
    return std * jax.random.truncated_normal(key, -2.0, 2.0, shape, jnp.float32)


def init_linear(key, d_in, d_out):
    # stored as (in, out); bias = 0 (matches torch trunc_normal_ / zero init)
    return trunc_normal(key, (d_in, d_out)), jnp.zeros((d_out,), jnp.float32)


def init_mlp3(key, d_in, d_out):
    k1, k2, k3 = jax.random.split(key, 3)
    return [init_linear(k1, d_in, HIDDEN_DIM),
            init_linear(k2, HIDDEN_DIM, HIDDEN_DIM),
            init_linear(k3, HIDDEN_DIM, d_out)]


def _zeros(shape):
    return jnp.zeros(shape, jnp.float32)


def _place(big, w, r0, c0):
    return big.at[r0:r0 + w.shape[0], c0:c0 + w.shape[1]].set(w)


def _bias_row(n, pieces):
    b = jnp.zeros((1, n), jnp.float32)
    for off, v in pieces:
        b = b.at[0, off:off + v.shape[0]].set(v)
    return b


def build_packed_params(key):
    ks = jax.random.split(key, 7)
    wb, bb = init_linear(ks[0], C, FEAT_DIM)                   # backbone stub linear
    head = init_mlp3(ks[1], FEAT_DIM, EMBED_DIM)
    query = init_mlp3(ks[2], FEAT_DIM, EMBED_DIM)
    key_m = init_mlp3(ks[3], FEAT_DIM, EMBED_DIM)
    cls_in = EMBED_DIM if IS_HEAD else FEAT_DIM
    cls_mlp = init_mlp3(ks[4], cls_in, NUM_CLASSES)
    kc1, kc2, kc3 = jax.random.split(ks[5], 3)
    cls_bais = [init_linear(kc1, cls_in, BAIS_H1),
                init_linear(kc2, BAIS_H1, BAIS_H2),
                init_linear(kc3, BAIS_H2, BOTTLENECK)]
    # TODO(synk): self.base is torch.empty (uninitialized); seeded deterministically here.
    base = jax.random.normal(ks[6], (BASE_N, FEAT_DIM), jnp.float32)

    bf = lambda a: a.astype(jnp.bfloat16)
    p = {}

    # backbone
    p["wb"] = bf(_place(_zeros((LANE, LANE)), wb, 0, 0))
    p["bb"] = _bias_row(LANE, [(0, bb)])

    # head + query packed tight: 64 lanes each -> one 128-lane slab
    (hw1, hb1), (hw2, hb2), (hw3, hb3) = head
    (qw1, qb1), (qw2, qb2), (qw3, qb3) = query
    p["hqw1"] = bf(_place(_place(_zeros((LANE, LANE)), hw1, 0, 0), qw1, 0, HIDDEN_DIM))
    p["hqb1"] = _bias_row(LANE, [(0, hb1), (HIDDEN_DIM, qb1)])
    p["hqw2"] = bf(_place(_place(_zeros((LANE, LANE)), hw2, 0, 0), qw2, HIDDEN_DIM, HIDDEN_DIM))
    p["hqb2"] = _bias_row(LANE, [(0, hb2), (HIDDEN_DIM, qb2)])
    p["hqw3"] = bf(_place(_place(_zeros((LANE, LANE)), hw3, 0, 0), qw3, HIDDEN_DIM, EMBED_DIM))
    p["hqb3"] = _bias_row(LANE, [(0, hb3), (EMBED_DIM, qb3)])

    # key MLP (hoisted constant branch; generously padded, DMA'd once ever)
    (kw1, kb1), (kw2, kb2), (kw3, kb3) = key_m
    p["kw1"] = bf(_place(_zeros((LANE, LANE)), kw1, 0, 0))
    p["kb1"] = _bias_row(LANE, [(0, kb1)])
    p["kw2"] = bf(_place(_zeros((LANE, LANE)), kw2, 0, 0))
    p["kb2"] = _bias_row(LANE, [(0, kb2)])
    p["kw3"] = bf(_place(_zeros((LANE, LANE)), kw3, 0, 0))
    p["kb3"] = _bias_row(LANE, [(0, kb3)])
    p["base"] = _place(_zeros((BASE_N, LANE)), base, 0, 0)

    # cls_head: mlp branch and bais branch kept separate (tight K/N, no
    # off-diagonal zero blocks, no mixed GELU/sigmoid lanes)
    (mw1, mb1), (mw2, mb2), (mw3, mb3) = cls_mlp
    (bw1, bv1), (bw2, bv2), (bw3, bv3) = cls_bais
    p["cm1"] = bf(_place(_zeros((LANE, HIDDEN_DIM)), mw1, CLS_ROW0, 0))     # (128, 64)
    p["cmb1"] = _bias_row(HIDDEN_DIM, [(0, mb1)])
    p["cm2"] = bf(mw2)                                                      # (64, 64)
    p["cmb2"] = _bias_row(HIDDEN_DIM, [(0, mb2)])
    p["cm3"] = bf(_place(_zeros((HIDDEN_DIM, LANE)), mw3, 0, 0))            # (64, 128)
    p["cmb3"] = _bias_row(LANE, [(0, mb3)])
    p["cb1"] = bf(_place(_zeros((LANE, BAIS_H1)), bw1, CLS_ROW0, 0))        # (128, 256)
    p["cbb1"] = _bias_row(BAIS_H1, [(0, bv1)])
    p["cb2"] = bf(bw2)                                                      # (256, 512)
    p["cbb2"] = _bias_row(BAIS_H2, [(0, bv2)])
    p["cb3"] = bf(_place(_zeros((BAIS_H2, LANE)), bw3, 0, 0))               # (512, 128)
    p["cbb3"] = _bias_row(LANE, [(0, bv3)])
    return p


# ------------------------------- pallas wrappers ----------------------------- #
def _const_spec(arr):
    # full-array block, constant index map -> stays VMEM-resident across steps
    return pl.BlockSpec(arr.shape, lambda i: (0, 0))


def compute_key_t(p):
    """key_embedding = key.mlp(base) -- constant, computed once and pre-packed:
    transposed into the query-lane rows, zero padded, cast to bf16 so the
    forward kernel's Coff matmul is a plain bf16 MXU matmul."""
    key_emb = pl.pallas_call(
        _key_mlp_kernel,
        out_shape=jax.ShapeDtypeStruct((BASE_N, LANE), jnp.float32),
        in_specs=[pl.BlockSpec(memory_space=VMEM)] * 7,
        out_specs=pl.BlockSpec(memory_space=VMEM),
    )(p["base"], p["kw1"], p["kb1"], p["kw2"], p["kb2"], p["kw3"], p["kb3"])
    key_t = jnp.zeros((LANE, LANE), jnp.float32)
    key_t = key_t.at[Q_OFF:Q_OFF + EMBED_DIM, :BASE_N].set(
        key_emb[:BASE_N, :EMBED_DIM].T)
    return key_t.astype(jnp.bfloat16)


def _senet_step(p, key_t, feats_pad, *, temperature, is_head):
    bpad = feats_pad.shape[0]
    kernel = functools.partial(_senet_kernel,
                               temperature=float(temperature),
                               is_head=bool(is_head))
    weights = (p["wb"], p["bb"],
               p["hqw1"], p["hqb1"], p["hqw2"], p["hqb2"], p["hqw3"], p["hqb3"],
               key_t,
               p["cm1"], p["cmb1"], p["cm2"], p["cmb2"], p["cm3"], p["cmb3"],
               p["cb1"], p["cbb1"], p["cb2"], p["cbb2"], p["cb3"], p["cbb3"])
    return pl.pallas_call(
        kernel,
        grid=(bpad // BLOCK_B,),
        out_shape=jax.ShapeDtypeStruct((bpad, OUT_W), jnp.float32),
        in_specs=[pl.BlockSpec((BLOCK_B, LANE), lambda i: (i, 0))]
                 + [_const_spec(w) for w in weights],
        out_specs=pl.BlockSpec((BLOCK_B, OUT_W), lambda i: (i, 0)),
        compiler_params=pltpu.CompilerParams(
            dimension_semantics=("parallel",),
            allow_input_fusion=[True] + [False] * len(weights)),
    )(feats_pad, *weights)


@functools.partial(jax.jit, static_argnames=("temperature", "is_head", "is_train"))
def senet_forward(p, key_t, x, *, temperature, is_head, is_train=True):
    b, c, h, w = x.shape
    # backbone stub: lane-dense GAP as a (B*C, H*W) reduction, then Linear in-kernel.
    # TODO(synk): real backbone is an injected external module; stubbed as GAP+Linear.
    feats = jnp.mean(x.reshape(b * c, h * w), axis=-1).reshape(b, c)
    bpad = pl.cdiv(b, BLOCK_B) * BLOCK_B
    feats_pad = jnp.zeros((bpad, LANE), jnp.float32).at[:b, :c].set(feats)

    slab = _senet_step(p, key_t, feats_pad, temperature=temperature, is_head=is_head)

    temp = jax.lax.stop_gradient(slab[:b, TEMP_OFF:TEMP_OFF + FEAT_DIM])     # x.detach()
    x_proj = slab[:b, HQ_OFF:HQ_OFF + EMBED_DIM]                             # head output
    coff = slab[:b, COFF_OFF:COFF_OFF + BASE_N]
    logits = (slab[:b, LOGIT_OFF:LOGIT_OFF + NUM_CLASSES],
              slab[:b, BAIS_OFF:BAIS_OFF + BOTTLENECK])                      # (logits, bais)
    if not is_train:
        return logits
    return temp, coff, x_proj, logits


# ----------------------------------- main ------------------------------------ #
if __name__ == "__main__":
    root = jax.random.PRNGKey(0)
    k_params, k_x = jax.random.split(root)

    params = build_packed_params(k_params)
    x = jax.random.normal(k_x, (B, C, H, W), jnp.float32)      # NCHW input

    # constant key branch hoisted: computed once, reused for every forward step
    key_t = jax.block_until_ready(compute_key_t(params))

    out = senet_forward(params, key_t, x,
                        temperature=TEMPERATURE, is_head=IS_HEAD, is_train=True)
    out = jax.block_until_ready(out)

    temp, coff, x_proj, (cls_logits, cls_bais) = out
    assert temp.shape == (B, FEAT_DIM)
    assert coff.shape == (B, BASE_N)
    assert x_proj.shape == (B, EMBED_DIM)
    assert cls_logits.shape == (B, NUM_CLASSES)
    assert cls_bais.shape == (B, BOTTLENECK)
    for a in (temp, coff, x_proj, cls_logits, cls_bais):
        assert bool(jnp.all(jnp.isfinite(a)))
    assert bool(jnp.allclose(jnp.sum(coff, axis=1), 1.0, atol=1e-4))
    print("KERNEL_OK")
</pallas_src>

<mosaic_0001>
module attributes {stable_mosaic.version = 11 : i64} {
  func.func @_key_mlp_kernel(%arg0: memref<16x128xf32, #tpu.memory_space<vmem>>, %arg1: memref<128x128xbf16, #tpu.memory_space<vmem>>, %arg2: memref<1x128xf32, #tpu.memory_space<vmem>>, %arg3: memref<128x128xbf16, #tpu.memory_space<vmem>>, %arg4: memref<1x128xf32, #tpu.memory_space<vmem>>, %arg5: memref<128x128xbf16, #tpu.memory_space<vmem>>, %arg6: memref<1x128xf32, #tpu.memory_space<vmem>>, %arg7: memref<16x128xf32, #tpu.memory_space<vmem>>) attributes {dimension_semantics = [], scalar_prefetch = 0 : i64, scratch_operands = 0 : i64, tpu.core_type = #tpu.core_type<tc>} {
    %c0 = arith.constant 0 : index
    %c0_0 = arith.constant 0 : index
    %0 = vector.load %arg0[%c0, %c0_0] : memref<16x128xf32, #tpu.memory_space<vmem>>, vector<16x128xf32>
    %1 = arith.truncf %0 : vector<16x128xf32> to vector<16x128xbf16>
    %c0_1 = arith.constant 0 : index
    %c0_2 = arith.constant 0 : index
    %2 = vector.load %arg1[%c0_1, %c0_2] : memref<128x128xbf16, #tpu.memory_space<vmem>>, vector<128x128xbf16>
    %cst = arith.constant dense<0.000000e+00> : vector<16x128xf32>
    %3 = tpu.matmul %1, %2, %cst {dimension_numbers = #tpu.dot_dimension_numbers<[1], [0], [0], [1], [0, 0, 1, 1], [], []>} : vector<16x128xbf16>, vector<128x128xbf16>, vector<16x128xf32> -> vector<16x128xf32>
    %c0_3 = arith.constant 0 : index
    %c0_4 = arith.constant 0 : index
    %4 = vector.load %arg2[%c0_3, %c0_4] : memref<1x128xf32, #tpu.memory_space<vmem>>, vector<1x128xf32>
    %5 = vector.broadcast %4 : vector<1x128xf32> to vector<16x128xf32>
    %6 = arith.addf %3, %5 : vector<16x128xf32>
    %cst_5 = arith.constant 5.000000e-01 : f32
    %7 = vector.broadcast %cst_5 : f32 to vector<16x128xf32>
    %8 = arith.mulf %7, %6 : vector<16x128xf32>
    %cst_6 = arith.constant 0.707106769 : f32
    %9 = vector.broadcast %cst_6 : f32 to vector<16x128xf32>
    %10 = arith.mulf %6, %9 : vector<16x128xf32>
    %11 = math.erf %10 : vector<16x128xf32>
    %cst_7 = arith.constant 1.000000e+00 : f32
    %12 = vector.broadcast %cst_7 : f32 to vector<16x128xf32>
    %13 = arith.addf %12, %11 : vector<16x128xf32>
    %14 = arith.mulf %8, %13 : vector<16x128xf32>
    %15 = arith.truncf %14 : vector<16x128xf32> to vector<16x128xbf16>
    %c0_8 = arith.constant 0 : index
    %c0_9 = arith.constant 0 : index
    %16 = vector.load %arg3[%c0_8, %c0_9] : memref<128x128xbf16, #tpu.memory_space<vmem>>, vector<128x128xbf16>
    %cst_10 = arith.constant dense<0.000000e+00> : vector<16x128xf32>
    %17 = tpu.matmul %15, %16, %cst_10 {dimension_numbers = #tpu.dot_dimension_numbers<[1], [0], [0], [1], [0, 0, 1, 1], [], []>} : vector<16x128xbf16>, vector<128x128xbf16>, vector<16x128xf32> -> vector<16x128xf32>
    %c0_11 = arith.constant 0 : index
    %c0_12 = arith.constant 0 : index
    %18 = vector.load %arg4[%c0_11, %c0_12] : memref<1x128xf32, #tpu.memory_space<vmem>>, vector<1x128xf32>
    %19 = vector.broadcast %18 : vector<1x128xf32> to vector<16x128xf32>
    %20 = arith.addf %17, %19 : vector<16x128xf32>
    %cst_13 = arith.constant 5.000000e-01 : f32
    %21 = vector.broadcast %cst_13 : f32 to vector<16x128xf32>
    %22 = arith.mulf %21, %20 : vector<16x128xf32>
    %cst_14 = arith.constant 0.707106769 : f32
    %23 = vector.broadcast %cst_14 : f32 to vector<16x128xf32>
    %24 = arith.mulf %20, %23 : vector<16x128xf32>
    %25 = math.erf %24 : vector<16x128xf32>
    %cst_15 = arith.constant 1.000000e+00 : f32
    %26 = vector.broadcast %cst_15 : f32 to vector<16x128xf32>
    %27 = arith.addf %26, %25 : vector<16x128xf32>
    %28 = arith.mulf %22, %27 : vector<16x128xf32>
    %29 = arith.truncf %28 : vector<16x128xf32> to vector<16x128xbf16>
    %c0_16 = arith.constant 0 : index
    %c0_17 = arith.constant 0 : index
    %30 = vector.load %arg5[%c0_16, %c0_17] : memref<128x128xbf16, #tpu.memory_space<vmem>>, vector<128x128xbf16>
    %cst_18 = arith.constant dense<0.000000e+00> : vector<16x128xf32>
    %31 = tpu.matmul %29, %30, %cst_18 {dimension_numbers = #tpu.dot_dimension_numbers<[1], [0], [0], [1], [0, 0, 1, 1], [], []>} : vector<16x128xbf16>, vector<128x128xbf16>, vector<16x128xf32> -> vector<16x128xf32>
    %c0_19 = arith.constant 0 : index
    %c0_20 = arith.constant 0 : index
    %32 = vector.load %arg6[%c0_19, %c0_20] : memref<1x128xf32, #tpu.memory_space<vmem>>, vector<1x128xf32>
    %33 = vector.broadcast %32 : vector<1x128xf32> to vector<16x128xf32>
    %34 = arith.addf %31, %33 : vector<16x128xf32>
    %c0_21 = arith.constant 0 : index
    %c0_22 = arith.constant 0 : index
    %35 = vector.load %arg7[%c0_21, %c0_22] : memref<16x128xf32, #tpu.memory_space<vmem>>, vector<16x128xf32>
    tpu.vector_store %arg7[%c0_21, %c0_22], %34 {strides = array<i32>} : memref<16x128xf32, #tpu.memory_space<vmem>>, vector<16x128xf32>,
    return
  }
}

</mosaic_0001>

<bundles_post_ra>
// kernel: tpu_custom_call.1
= control target key start
LH: loop header
LB: loop body
LE: loop exit
PB: predicated region body
PF: predicated region fallthrough
CT: control target
= control target key end

     0   :  { %12 = vsyncpa [#allocation3], 0  ;;  %s927_s0 = inlined_call_operand.hbm [shape: f32[16,128], index: 0, kind: input, shape index: {}]   ;;  %s928_s1 = inlined_call_operand.hbm [shape: bf16[128,128], index: 1, kind: input, shape index: {}]   ;;  %s929_s2 = inlined_call_operand.vmem [shape: f32[1,128], index: 2, kind: input, shape index: {}]   ;;  %s930_s3 = inlined_call_operand.hbm [shape: bf16[128,128], index: 3, kind: input, shape index: {}]   ;;  %s931_s4 = inlined_call_operand.vmem [shape: f32[1,128], index: 4, kind: input, shape index: {}]   ;;  %s932_s5 = inlined_call_operand.hbm [shape: bf16[128,128], index: 5, kind: input, shape index: {}]   ;;  %s933_s6 = inlined_call_operand.vmem [shape: f32[1,128], index: 6, kind: input, shape index: {}]   ;;  %s934_s7 = inlined_call_operand.hbm [shape: f32[16,128], index: 7, kind: output, shape index: {}]  }
   0x1   :  { %13 = vsyncpa [#allocation6], 0 }
   0x2   :  { %14 = vsyncpa [#allocation9], 0  ;;  %s33_s26 = sshll.u32 %s928_s1, 4  ;;  %s34_s26 = int_to_ptr.hbm [resolvable:$true] %s33_s26 }
   0x3   :  { %15 = vsyncpa [#allocation4], 0  ;;  %s812_s27 = smov [#allocation5]   ;;  %s20_s8 = sshll.u32 %s927_s0, 4  ;;  %s21_s8 = int_to_ptr.hbm [resolvable:$true] %s20_s8 }
   0x4   :  { %s35_s28 = sshll.u32 %s812_s27, 4  ;;  %s813_s9 = smov 64   ;;  %s36_s28 = int_to_ptr.vmem [resolvable:$true] %s35_s28 }
   0x5   :  { %s814_s10 = smov 4   ;;  %s815_s11 = smov [#allocation2]  }
   0x6   :  { %41 = dma.hbm_to_vmem [thread:$0]  %s34_s26, 1024, %s36_s28, [#allocation6], %s813_s9, %s813_s9, %s814_s10  }
   0x7   :  { %s22_s12 = sshll.u32 %s815_s11, 4  ;;  %s816_s13 = smov 128   ;;  %s23_s12 = int_to_ptr.vmem [resolvable:$true] %s22_s12 }
   0x8   :  { %s817_s14 = smov 8   ;;  %s48_s16 = sshll.u32 %s930_s3, 4  ;;  %s49_s16 = int_to_ptr.hbm [resolvable:$true] %s48_s16 }
   0x9   :  { %28 = dma.hbm_to_vmem [thread:$0]  %s21_s8, 256, %s23_s12, [#allocation3], %s816_s13, %s816_s13, %s817_s14  }
   0xa   :  { %s818_s17 = smov [#allocation7]   ;;  %s63_s20 = sshll.u32 %s932_s5, 4  ;;  %s64_s20 = int_to_ptr.hbm [resolvable:$true] %s63_s20 }
   0xb   :  { %s50_s0 = sshll.u32 %s818_s17, 4  ;;  %s819_s21 = smov [#allocation8]   ;;  %s51_s0 = int_to_ptr.vmem [resolvable:$true] %s50_s0 }
   0xc   :  { %56 = dma.hbm_to_vmem [thread:$0]  %s49_s16, 1024, %s51_s0, [#allocation6], %s813_s9, %s813_s9, %s814_s10  }
   0xd   :  { %s65_s22 = sshll.u32 %s819_s21, 4  ;;  %s66_s22 = int_to_ptr.vmem [resolvable:$true] %s65_s22 }
   0xe   :  { %71 = dma.hbm_to_vmem [thread:$0]  %s64_s20, 1024, %s66_s22, [#allocation9], %s813_s9, %s813_s9, %s814_s10  }
   0xf   :  { %804 = dma.done.wait [#allocation3], 256  }
  0x10   :  { %805 = vsyncadd [#allocation3], 4294967040 }
  0x11   :  { %806 = dma.done.wait [#allocation6], 2048  }
  0x12   :  { %807 = vsyncadd [#allocation6], 4294965248 }
  0x13   :  { %808 = dma.done.wait [#allocation9], 1024  }
  0x14   :  { %809 = vsyncadd [#allocation9], 4294966272  ;;  %v647_v0 = vld [vmem:[#allocation5 + $0x38] sm:$0xff]  ;;  %v646_v1 = vld [vmem:[#allocation5 + $0x30] sm:$0xff]  ;;  %s820_s25 = smov [#allocation10]   ;;  %s525_s29 = sshll.u32 %s934_s7, 4  ;;  %s526_s29 = int_to_ptr.hbm [resolvable:$true] %s525_s29 }
  0x15   :  { %161 = vmatpush.bf16.msra.mxu0 %v647_v0  ;;  %v645_v2 = vld [vmem:[#allocation5 + $0x28] sm:$0xff]  ;;  %v644_v3 = vld [vmem:[#allocation5 + $0x20] sm:$0xff]  ;;  %v643_v4 = vld [vmem:[#allocation5 + $0x18] sm:$0xff]  ;;  %s523_s26 = sshll.u32 %s820_s25, 4  ;;  %s524_s26 = int_to_ptr.vmem [resolvable:$true] %s523_s26 }
  0x16   :  { %v642_v5 = vld [vmem:[#allocation5 + $0x10] sm:$0xff]  ;;  %v641_v6 = vld [vmem:[#allocation5 + $0x8] sm:$0xff]  ;;  %v640_v7 = vld [vmem:[#allocation5] sm:$0xff] }
  0x17   :  { %v90_v8 = vld [vmem:[#allocation2] sm:$0xff]  ;;  %v91_v9 = vld [vmem:[#allocation2 + $0x8] sm:$0xff]  ;;  %v653_v18 = vld [vmem:[#allocation7 + $0x28] sm:$0xff] }
  0x18   :  { %v92_v10 = vpack.c.bf16 %v91_v9, %v90_v8  ;;  %v673_v11 = vld [vmem:[%s929_s2] ss:$0 sm:$0xff]  ;;  %v655_v12 = vld [vmem:[#allocation7 + $0x38] sm:$0xff]  ;;  %v652_v23 = vld [vmem:[#allocation7 + $0x20] sm:$0xff] }
  0x19   :  { %162 = vmatpush.bf16.msra.mxu0 %v646_v1  ;;  %332 = vmatpush.bf16.msra.mxu1 %v655_v12  ;;  %v654_v16 = vld [vmem:[#allocation7 + $0x30] sm:$0xff]  ;;  %v651_v29 = vld [vmem:[#allocation7 + $0x18] sm:$0xff]  ;;  %v649_v43 = vld [vmem:[#allocation7 + $0x8] sm:$0xff] }
  0x1a   :  { %v650_v35 = vld [vmem:[#allocation7 + $0x10] sm:$0xff]  ;;  %v648_v50 = vld [vmem:[#allocation7] sm:$0xff] }
  0x1d   :  { %163 = vmatpush.bf16.msra.mxu0 %v645_v2  ;;  %333 = vmatpush.bf16.msra.mxu1 %v654_v16 }
  0x21   :  { %164 = vmatpush.bf16.msra.mxu0 %v644_v3  ;;  %334 = vmatpush.bf16.msra.mxu1 %v653_v18 }
  0x25   :  { %165 = vmatpush.bf16.msra.mxu0 %v643_v4  ;;  %335 = vmatpush.bf16.msra.mxu1 %v652_v23 }
  0x29   :  { %166 = vmatpush.bf16.msra.mxu0 %v642_v5  ;;  %336 = vmatpush.bf16.msra.mxu1 %v651_v29 }
  0x2d   :  { %167 = vmatpush.bf16.msra.mxu0 %v641_v6  ;;  %337 = vmatpush.bf16.msra.mxu1 %v650_v35 }
  0x31   :  { %168 = vmatpush.bf16.msra.mxu0 %v640_v7  ;;  %338 = vmatpush.bf16.msra.mxu1 %v649_v43  ;;  %v663_v43 = vld [vmem:[#allocation8 + $0x38] sm:$0xff] }
  0x32   :  { %503 = vmatpush.bf16.msra.mxu2 %v663_v43 }
  0x34   :  { %169 = vmatmul.bf16.vlgmr.msra.gmra.mxu0 %v92_v10 }
  0x35   :  { %339 = vmatpush.bf16.msra.mxu1 %v648_v50 }
  0xb1   :  { %v170_v13 = vpop.f32.mrf.mxu0 }
  0xb2   :  { %v879_v14 = vadd.f32 %v673_v11, %v170_v13 }
  0xb4   :  { %v882_v15 = vmul.f32 0.70710677, %v879_v14 }
  0xb6   :  { %v179_v17 = vmul.f32 %v882_v15, %v882_v15 }
  0xb8   :  { %v180_v19 = vmin.f32 %v179_v17, 16.0 }
  0xb9   :  { %v172_v20 = vpop.f32.mrf.mxu0 }
  0xba   :  { %v181_v21 = vmul.f32 2.1237322e-06, %v180_v19  ;;  %v886_v22 = vadd.f32 %v673_v11, %v172_v20  ;;  %v192_v24 = vmul.f32 3.8918573e-05, %v180_v19 }
  0xbc   :  { %v182_v25 = vadd.f32 0.00028619796, %v181_v21  ;;  %v889_v26 = vmul.f32 0.70710677, %v886_v22  ;;  %v193_v27 = vadd.f32 0.001143296, %v192_v24 }
  0xbe   :  { %v219_v28 = vmul.f32 %v889_v26, %v889_v26  ;;  %v183_v30 = vmul.f32 %v182_v25, %v180_v19  ;;  %v194_v31 = vmul.f32 %v193_v27, %v180_v19 }
  0xc0   :  { %v220_v32 = vmin.f32 %v219_v28, 16.0  ;;  %v195_v33 = vadd.f32 0.014752088, %v194_v31  ;;  %v184_v37 = vadd.f32 0.0036580483, %v183_v30 }
  0xc2   :  { %v221_v34 = vmul.f32 2.1237322e-06, %v220_v32  ;;  %v232_v36 = vmul.f32 3.8918573e-05, %v220_v32  ;;  %v196_v38 = vmul.f32 %v195_v33, %v180_v19  ;;  %v185_v45 = vmul.f32 %v184_v37, %v180_v19 }
  0xc3   :  { %v176_v37 = vmul.f32 0.5, %v886_v22 }
  0xc4   :  { %v222_v39 = vadd.f32 0.00028619796, %v221_v34  ;;  %v233_v40 = vadd.f32 0.001143296, %v232_v36  ;;  %v197_v41 = vadd.f32 0.112945676, %v196_v38 }
  0xc5   :  { %v186_v52 = vadd.f32 0.05243302, %v185_v45  ;;  %v175_v36 = vmul.f32 0.5, %v879_v14  ;;  %v662_v14 = vld [vmem:[#allocation8 + $0x30] sm:$0xff] }
  0xc6   :  { %v223_v42 = vmul.f32 %v222_v39, %v220_v32  ;;  %v234_v44 = vmul.f32 %v233_v40, %v220_v32  ;;  %v198_v46 = vmul.f32 %v197_v41, %v180_v19  ;;  %504 = vmatpush.bf16.msra.mxu2 %v662_v14 }
  0xc7   :  { %v187_v58 = vmul.f32 %v186_v52, %v180_v19  ;;  %v660_v52 = vld [vmem:[#allocation8 + $0x20] sm:$0xff] }
  0xc8   :  { %v224_v47 = vadd.f32 0.0036580483, %v223_v42  ;;  %v235_v48 = vadd.f32 0.014752088, %v234_v44  ;;  %v199_v49 = vadd.f32 0.4994258, %v198_v46 }
  0xc9   :  { %v188_v62 = vadd.f32 0.18741608, %v187_v58  ;;  %v661_v46 = vld [vmem:[#allocation8 + $0x28] sm:$0xff]  ;;  %v659_v58 = vld [vmem:[#allocation8 + $0x18] sm:$0xff] }
  0xca   :  { %v236_v51 = vmul.f32 %v235_v48, %v220_v32  ;;  %v200_v53 = vmul.f32 %v199_v49, %v180_v19  ;;  %v225_v54 = vmul.f32 %v224_v47, %v220_v32  ;;  %505 = vmatpush.bf16.msra.mxu2 %v661_v46 }
  0xcb   :  { %v189_v3 = vmul.f32 %v188_v62, %v180_v19 }
  0xcc   :  { %v237_v55 = vadd.f32 0.112945676, %v236_v51  ;;  %v201_v56 = vadd.f32 1.0, %v200_v53  ;;  %v226_v59 = vadd.f32 0.05243302, %v225_v54 }
  0xcd   :  { %v190_v9 = vadd.f32 1.1283791, %v189_v3 }
  0xce   :  { %v238_v57 = vmul.f32 %v237_v55, %v220_v32  ;;  %676 = vrcp.f32 %v201_v56  ;;  %v227_v63 = vmul.f32 %v226_v59, %v220_v32  ;;  %v213_v6 = vand.u32 2147483648, %v201_v56  ;;  %506 = vmatpush.bf16.msra.mxu2 %v660_v52 }
  0xcf   :  { %v211_v8 = vand.u32 2147483647, %v201_v56  ;;  %vm207_vm1 = vweird.f32 %v201_v56  ;;  %v191_v18 = vmul.f32 %v190_v9, %v882_v15  ;;  %v657_v9 = vld [vmem:[#allocation8 + $0x8] sm:$0xff] }
  0xd0   :  { %v239_v60 = vadd.f32 0.4994258, %v238_v57  ;;  %v228_v4 = vadd.f32 0.18741608, %v227_v63  ;;  %v214_v13 = vor.u32 1.1754944e-38, %v213_v6 }
  0xd1   :  { %vm212_vm3 = vcmp.eq.f32.partialorder %v211_v8, 8.507059e+37 }
  0xd2   :  { %v240_v61 = vmul.f32 %v239_v60, %v220_v32  ;;  %v229_v11 = vmul.f32 %v228_v4, %v220_v32  ;;  %507 = vmatpush.bf16.msra.mxu2 %v659_v58 }
  0xd4   :  { %v241_v0 = vadd.f32 1.0, %v240_v61  ;;  %v677_v1 = vpop.eup %676  ;;  %v230_v21 = vadd.f32 1.1283791, %v229_v11 }
  0xd5   :  { %v203_v2 = vmul.f32 %v677_v1, %v201_v56  ;;  %vm208_vm0 = vweird.f32 %v677_v1 }
  0xd6   :  { %678 = vrcp.f32 %v241_v0  ;;  %vm209_vm2 = vmor %vm207_vm1, %vm208_vm0  ;;  %v253_v23 = vand.u32 2147483648, %v241_v0  ;;  %v251_v27 = vand.u32 2147483647, %v241_v0  ;;  %vm247_vm5 = vweird.f32 %v241_v0 }
  0xd7   :  { %v204_v5 = vsub.f32 1.0, %v203_v2  ;;  %v231_v30 = vmul.f32 %v230_v21, %v889_v26  ;;  %v674_v26 = vld [vmem:[%s931_s4] ss:$0 sm:$0xff] }
  0xd8   :  { %v254_v29 = vor.u32 1.1754944e-38, %v253_v23  ;;  %vm252_vm7 = vcmp.eq.f32.partialorder %v251_v27, 8.507059e+37 }
  0xd9   :  { %v205_v7 = vmul.f32 %v677_v1, %v204_v5 }
  0xdb   :  { %v206_v12 = vadd.f32 %v677_v1, %v205_v7 }
  0xdc   :  { %v679_v10 = vpop.eup %678 }
  0xdd   :  { %v243_v16 = vmul.f32 %v679_v10, %v241_v0  ;;  %v210_v17 = vsel %vm209_vm2, %v677_v1, %v206_v12  ;;  %vm248_vm4 = vweird.f32 %v679_v10  ;;  %v658_v1 = vld [vmem:[#allocation8 + $0x10] sm:$0xff] }
  0xde   :  { %v215_v20 = vsel %vm212_vm3, %v214_v13, %v210_v17  ;;  %vm249_vm6 = vmor %vm247_vm5, %vm248_vm4  ;;  %508 = vmatpush.bf16.msra.mxu2 %v658_v1 }
  0xdf   :  { %v244_v19 = vsub.f32 1.0, %v243_v16  ;;  %v216_v24 = vmul.f32 %v215_v20, %v191_v18  ;;  %v656_v18 = vld [vmem:[#allocation8] sm:$0xff] }
  0xe1   :  { %v245_v25 = vmul.f32 %v679_v10, %v244_v19  ;;  %v572_v31 = vclamps-f32 %v216_v24, 1.0 }
  0xe2   :  { %509 = vmatpush.bf16.msra.mxu2 %v657_v9 }
  0xe3   :  { %v246_v28 = vadd.f32 %v679_v10, %v245_v25  ;;  %v259_v35 = vadd.f32 1.0, %v572_v31 }
  0xe5   :  { %v250_v32 = vsel %vm249_vm6, %v679_v10, %v246_v28  ;;  %v261_v39 = vmul.f32 %v259_v35, %v175_v36 }
  0xe6   :  { %v255_v33 = vsel %vm252_vm7, %v254_v29, %v250_v32  ;;  %510 = vmatpush.bf16.msra.mxu2 %v656_v18 }
  0xe7   :  { %v256_v34 = vmul.f32 %v255_v33, %v231_v30 }
  0xe9   :  { %v573_v15 = vclamps-f32 %v256_v34, 1.0 }
  0xeb   :  { %v260_v38 = vadd.f32 1.0, %v573_v15 }
  0xed   :  { %v262_v40 = vmul.f32 %v260_v38, %v176_v37 }
  0xef   :  { %v263_v41 = vpack.c.bf16 %v262_v40, %v261_v39 }
  0xf1   :  { %340 = vmatmul.bf16.vlgmr.msra.gmra.mxu1 %v263_v41 }
 0x16e   :  { %v341_v42 = vpop.f32.mrf.mxu1 }
 0x16f   :  { %v900_v44 = vadd.f32 %v674_v26, %v341_v42 }
 0x171   :  { %v903_v45 = vmul.f32 0.70710677, %v900_v44 }
 0x173   :  { %v350_v22 = vmul.f32 %v903_v45, %v903_v45 }
 0x175   :  { %v351_v47 = vmin.f32 %v350_v22, 16.0 }
 0x176   :  { %v343_v48 = vpop.f32.mrf.mxu1 }
 0x177   :  { %v352_v49 = vmul.f32 2.1237322e-06, %v351_v47  ;;  %v907_v50 = vadd.f32 %v674_v26, %v343_v48  ;;  %v363_v51 = vmul.f32 3.8918573e-05, %v351_v47 }
 0x179   :  { %v353_v53 = vadd.f32 0.00028619796, %v352_v49  ;;  %v910_v54 = vmul.f32 0.70710677, %v907_v50  ;;  %v364_v55 = vadd.f32 0.001143296, %v363_v51 }
 0x17a   :  { %v347_v1 = vmul.f32 0.5, %v907_v50 }
 0x17b   :  { %v390_v56 = vmul.f32 %v910_v54, %v910_v54  ;;  %v354_v57 = vmul.f32 %v353_v53, %v351_v47  ;;  %v365_v59 = vmul.f32 %v364_v55, %v351_v47 }
 0x17d   :  { %v391_v60 = vmin.f32 %v390_v56, 16.0  ;;  %v366_v61 = vadd.f32 0.014752088, %v365_v59  ;;  %v355_v0 = vadd.f32 0.0036580483, %v354_v57 }
 0x17f   :  { %v392_v62 = vmul.f32 2.1237322e-06, %v391_v60  ;;  %v403_v63 = vmul.f32 3.8918573e-05, %v391_v60  ;;  %v367_v2 = vmul.f32 %v366_v61, %v351_v47  ;;  %v356_v8 = vmul.f32 %v355_v0, %v351_v47 }
 0x180   :  { %v346_v0 = vmul.f32 0.5, %v900_v44 }
 0x181   :  { %v393_v3 = vadd.f32 0.00028619796, %v392_v62  ;;  %v404_v4 = vadd.f32 0.001143296, %v403_v63  ;;  %v368_v5 = vadd.f32 0.112945676, %v367_v2 }
 0x182   :  { %v357_v17 = vadd.f32 0.05243302, %v356_v8 }
 0x183   :  { %v394_v6 = vmul.f32 %v393_v3, %v391_v60  ;;  %v405_v7 = vmul.f32 %v404_v4, %v391_v60  ;;  %v369_v10 = vmul.f32 %v368_v5, %v351_v47 }
 0x184   :  { %v358_v25 = vmul.f32 %v357_v17, %v351_v47 }
 0x185   :  { %v395_v11 = vadd.f32 0.0036580483, %v394_v6  ;;  %v406_v12 = vadd.f32 0.014752088, %v405_v7  ;;  %v370_v13 = vadd.f32 0.4994258, %v369_v10 }
 0x186   :  { %v359_v30 = vadd.f32 0.18741608, %v358_v25 }
 0x187   :  { %v407_v16 = vmul.f32 %v406_v12, %v391_v60  ;;  %v371_v20 = vmul.f32 %v370_v13, %v351_v47  ;;  %v396_v19 = vmul.f32 %v395_v11, %v391_v60 }
 0x188   :  { %v360_v15 = vmul.f32 %v359_v30, %v351_v47 }
 0x189   :  { %v408_v21 = vadd.f32 0.112945676, %v407_v16  ;;  %v372_v23 = vadd.f32 1.0, %v371_v20  ;;  %v397_v27 = vadd.f32 0.05243302, %v396_v19 }
 0x18a   :  { %v361_v40 = vadd.f32 1.1283791, %v360_v15 }
 0x18b   :  { %v409_v24 = vmul.f32 %v408_v21, %v391_v60  ;;  %680 = vrcp.f32 %v372_v23  ;;  %v398_v31 = vmul.f32 %v397_v27, %v391_v60  ;;  %v384_v37 = vand.u32 2147483648, %v372_v23 }
 0x18c   :  { %v382_v39 = vand.u32 2147483647, %v372_v23  ;;  %vm378_vm9 = vweird.f32 %v372_v23  ;;  %v362_v46 = vmul.f32 %v361_v40, %v903_v45 }
 0x18d   :  { %v410_v28 = vadd.f32 0.4994258, %v409_v24  ;;  %v399_v35 = vadd.f32 0.18741608, %v398_v31  ;;  %v385_v43 = vor.u32 1.1754944e-38, %v384_v37 }
 0x18e   :  { %vm383_vm11 = vcmp.eq.f32.partialorder %v382_v39, 8.507059e+37 }
 0x18f   :  { %v411_v29 = vmul.f32 %v410_v28, %v391_v60  ;;  %v400_v26 = vmul.f32 %v399_v35, %v391_v60 }
 0x191   :  { %v412_v32 = vadd.f32 1.0, %v411_v29  ;;  %v681_v33 = vpop.eup %680  ;;  %v401_v49 = vadd.f32 1.1283791, %v400_v26 }
 0x192   :  { %v374_v34 = vmul.f32 %v681_v33, %v372_v23  ;;  %vm379_vm8 = vweird.f32 %v681_v33 }
 0x193   :  { %682 = vrcp.f32 %v412_v32  ;;  %vm380_vm10 = vmor %vm378_vm9, %vm379_vm8  ;;  %v424_v51 = vand.u32 2147483648, %v412_v32  ;;  %v422_v55 = vand.u32 2147483647, %v412_v32  ;;  %vm418_vm13 = vweird.f32 %v412_v32 }
 0x194   :  { %v375_v36 = vsub.f32 1.0, %v374_v34  ;;  %v402_v58 = vmul.f32 %v401_v49, %v910_v54  ;;  %v675_v54 = vld [vmem:[%s933_s6] ss:$0 sm:$0xff] }
 0x195   :  { %v425_v57 = vor.u32 1.1754944e-38, %v424_v51  ;;  %vm423_vm15 = vcmp.eq.f32.partialorder %v422_v55, 8.507059e+37 }
 0x196   :  { %v376_v38 = vmul.f32 %v681_v33, %v375_v36 }
 0x198   :  { %v377_v42 = vadd.f32 %v681_v33, %v376_v38 }
 0x199   :  { %v683_v41 = vpop.eup %682 }
 0x19a   :  { %v414_v14 = vmul.f32 %v683_v41, %v412_v32  ;;  %v381_v22 = vsel %vm380_vm10, %v681_v33, %v377_v42  ;;  %vm419_vm12 = vweird.f32 %v683_v41 }
 0x19b   :  { %v386_v48 = vsel %vm383_vm11, %v385_v43, %v381_v22  ;;  %vm420_vm14 = vmor %vm418_vm13, %vm419_vm12 }
 0x19c   :  { %v415_v47 = vsub.f32 1.0, %v414_v14  ;;  %v387_v52 = vmul.f32 %v386_v48, %v362_v46 }
 0x19e   :  { %v416_v53 = vmul.f32 %v683_v41, %v415_v47  ;;  %v606_v59 = vclamps-f32 %v387_v52, 1.0 }
 0x1a0   :  { %v417_v56 = vadd.f32 %v683_v41, %v416_v53  ;;  %v430_v63 = vadd.f32 1.0, %v606_v59 }
 0x1a2   :  { %v421_v60 = vsel %vm420_vm14, %v683_v41, %v417_v56  ;;  %v432_v3 = vmul.f32 %v430_v63, %v346_v0 }
 0x1a3   :  { %v426_v61 = vsel %vm423_vm15, %v425_v57, %v421_v60 }
 0x1a4   :  { %v427_v62 = vmul.f32 %v426_v61, %v402_v58 }
 0x1a6   :  { %v607_v45 = vclamps-f32 %v427_v62, 1.0 }
 0x1a8   :  { %v431_v2 = vadd.f32 1.0, %v607_v45 }
 0x1aa   :  { %v433_v4 = vmul.f32 %v431_v2, %v347_v1 }
 0x1ac   :  { %v434_v5 = vpack.c.bf16 %v433_v4, %v432_v3 }
 0x1ae   :  { %511 = vmatmul.bf16.vlgmr.msra.gmra.mxu2 %v434_v5 }
 0x231   :  { %v512_v6 = vpop.f32.mrf.mxu2 }
 0x232   :  { %v513_v7 = vadd.f32 %v675_v54, %v512_v6 }
 0x234   :  { %517 = vst [vmem:[#allocation10] sm:$0xff] %v513_v7 }
 0x239   :  { %v514_v44 = vpop.f32.mrf.mxu2 }
 0x23a   :  { %v515_v50 = vadd.f32 %v675_v54, %v514_v44 }
 0x23c   :  { %518 = vst [vmem:[#allocation10 + $0x8] sm:$0xff] %v515_v50 }
 0x23d   :  { %531 = dma.vmem_to_hbm [thread:$0]  %s524_s26, 256, %s526_s29, [#allocation4], %s816_s13, %s816_s13, %s817_s14  }
 0x23e   :  { %810 = dma.done.wait [#allocation4], 256  }
 0x23f   :  { %811 = vsyncadd [#allocation4], 4294967040 }
 0x240   :  { %536 = vsyncpa [#allocation3], 1 }
 0x241   :  { %537 = vsyncpa [#allocation6], 1 }
 0x242   :  { %538 = vsyncpa [#allocation9], 1 }
 0x243   :  { %539 = vsyncpa [#allocation4], 1 }

</bundles_post_ra>
